<compile_context>
chip_gen: v5e
topology: v5e:2x2
jax: 0.10.0
libtpu: 0.0.40
codegen_flags: <defaults>
</compile_context>

<pallas_src>
import jax
import jax.numpy as jnp
from jax.experimental import pallas as pl
from jax.experimental.pallas import tpu as pltpu


def _round_up(x, m):
    return ((x + m - 1) // m) * m


def _wf_kernel(x_ref, w_ref, b_ref, o_ref, acc_ref):
    k = pl.program_id(1)

    @pl.when(k == 0)
    def _init():
        acc_ref[...] = jnp.zeros_like(acc_ref)

    # MXU matmul with f32 accumulation into the resident scratch tile.
    acc_ref[...] += jnp.dot(
        x_ref[...], w_ref[...], preferred_element_type=jnp.float32
    )

    @pl.when(k == pl.num_programs(1) - 1)
    def _epilogue():
        # Bias + sigmoid in f32 (v5e VPU/EUP has no bf16 path); cast on store.
        z = acc_ref[...] + b_ref[...]
        o_ref[...] = jax.nn.sigmoid(z).astype(o_ref.dtype)


def wf_forward(x, w, b, *, tile_b=256, tile_k=512, use_bf16_mxu=False):
    """y = sigmoid(x @ w + b). x: (B, N), w: (N, H), b: (H,)."""
    B, N = x.shape
    N2, H = w.shape
    assert N == N2 and b.shape == (H,)
    out_dtype = x.dtype

    # ---- tile / padding choices -------------------------------------------
    # Batch tile: fixed (MXU-aligned) so the grid has many steps and the
    # BlockSpec pipeline overlaps DMA with compute; clamp for tiny batches.
    tb = tile_b if B >= tile_b else _round_up(B, 8)
    B_pad = _round_up(B, tb)

    # Lane-dense output: pad H to a multiple of 128; full padded H kept
    # resident per batch tile.
    H_pad = _round_up(H, 128)
    # TODO(synk): also tile H if tile_k * H_pad stops fitting the VMEM budget
    # (very large hidden sizes); for typical WF sizes full-H residency wins.

    # K (= N) tiling so the weight streams through VMEM in (tk, H_pad) slabs.
    if N <= 128:
        tk, N_pad = N, N
    else:
        N_pad = _round_up(N, 128)
        if N_pad % tile_k == 0:
            tk = tile_k
        elif N_pad % 256 == 0:
            tk = 256
        else:
            tk = 128
    grid = (B_pad // tb, N_pad // tk)

    # ---- host-side padding / dtype prep ------------------------------------
    mxu_dtype = jnp.bfloat16 if use_bf16_mxu else x.dtype
    x_p = x.astype(mxu_dtype)
    w_p = w.astype(mxu_dtype)
    if (B_pad, N_pad) != (B, N):
        x_p = jnp.pad(x_p, ((0, B_pad - B), (0, N_pad - N)))
    if (N_pad, H_pad) != (N, H):
        w_p = jnp.pad(w_p, ((0, N_pad - N), (0, H_pad - H)))
    b_p = b.astype(jnp.float32)
    if H_pad != H:
        b_p = jnp.pad(b_p, (0, H_pad - H))
    b2d = b_p.reshape(1, H_pad)

    # ---- VMEM budget & cost hint -------------------------------------------
    in_bytes = jnp.dtype(mxu_dtype).itemsize
    out_bytes = jnp.dtype(out_dtype).itemsize
    needed = 2 * (tb * tk + tk * H_pad) * in_bytes        # x, w double-buffered
    needed += 2 * tb * H_pad * out_bytes                  # out double-buffered
    needed += (tb + 1) * H_pad * 4                        # acc scratch + bias
    vmem_limit = int(min(max(2 * needed, 16 * 1024 * 1024), 64 * 1024 * 1024))

    cost = pl.CostEstimate(
        flops=2 * B_pad * N_pad * H_pad,
        transcendentals=B_pad * H_pad,
        bytes_accessed=in_bytes * (B_pad * N_pad + grid[0] * N_pad * H_pad)
        + out_bytes * B_pad * H_pad,
    )

    out = pl.pallas_call(
        _wf_kernel,
        out_shape=jax.ShapeDtypeStruct((B_pad, H_pad), out_dtype),
        grid_spec=pltpu.PrefetchScalarGridSpec(
            num_scalar_prefetch=0,
            grid=grid,
            in_specs=[
                pl.BlockSpec((tb, tk), lambda i, k: (i, k)),      # x tile
                pl.BlockSpec((tk, H_pad), lambda i, k: (k, 0)),   # weight K-slab
                pl.BlockSpec((1, H_pad), lambda i, k: (0, 0)),    # bias row
            ],
            out_specs=pl.BlockSpec((tb, H_pad), lambda i, k: (i, 0)),
            scratch_shapes=[pltpu.VMEM((tb, H_pad), jnp.float32)],
        ),
        compiler_params=pltpu.CompilerParams(
            dimension_semantics=("parallel", "arbitrary"),
            vmem_limit_bytes=vmem_limit,
        ),
        cost_estimate=cost,
    )(x_p, w_p, b2d)

    return out[:B, :H]


if __name__ == "__main__":
    key = jax.random.PRNGKey(0)

    # Small shapes consistent with WF(N, HIDDEN): batch=8, N=32, HIDDEN=32.
    # (At this size plain XLA fusion would beat any Pallas kernel; this call
    #  just validates the kernel at the module's demo shape.)
    B, N, HIDDEN = 8, 32, 32
    kx, kw, kb, krest = jax.random.split(key, 4)
    x = jax.random.normal(kx, (B, N), dtype=jnp.float32)
    bound = 1.0 / jnp.sqrt(jnp.float32(N))
    w = jax.random.uniform(kw, (N, HIDDEN), minval=-bound, maxval=bound,
                           dtype=jnp.float32)
    b = jax.random.uniform(kb, (HIDDEN,), minval=-bound, maxval=bound,
                           dtype=jnp.float32)

    y = wf_forward(x, w, b)
    jax.block_until_ready(y)
    y_ref = jax.nn.sigmoid(x @ w + b)
    assert y.shape == (B, HIDDEN)
    assert jnp.allclose(y, y_ref, atol=1e-5, rtol=1e-5)

    # Exercise the tiled path: multi-step batch grid, K tiling, H/B padding.
    B2, N2, H2 = 512, 384, 160
    ka, kc, kd = jax.random.split(krest, 3)
    x2 = jax.random.normal(ka, (B2, N2), dtype=jnp.float32)
    bound2 = 1.0 / jnp.sqrt(jnp.float32(N2))
    w2 = jax.random.uniform(kc, (N2, H2), minval=-bound2, maxval=bound2,
                            dtype=jnp.float32)
    b2 = jax.random.uniform(kd, (H2,), minval=-bound2, maxval=bound2,
                            dtype=jnp.float32)
    y2 = wf_forward(x2, w2, b2)
    jax.block_until_ready(y2)
    y2_ref = jax.nn.sigmoid(x2 @ w2 + b2)
    assert y2.shape == (B2, H2)
    assert jnp.allclose(y2, y2_ref, atol=1e-4, rtol=1e-4)

    print("KERNEL_OK")
</pallas_src>

<mosaic_0001>
module attributes {stable_mosaic.version = 11 : i64} {
  func.func @_wf_kernel(%arg0: i32, %arg1: i32, %arg2: memref<8x32xf32, #tpu.memory_space<vmem>>, %arg3: memref<32x128xf32, #tpu.memory_space<vmem>>, %arg4: memref<1x128xf32, #tpu.memory_space<vmem>>, %arg5: memref<8x128xf32, #tpu.memory_space<vmem>>, %arg6: memref<8x128xf32, #tpu.memory_space<vmem>>) attributes {dimension_semantics = [#tpu.dimension_semantics<parallel>, #tpu.dimension_semantics<arbitrary>], iteration_bounds = array<i64: 1, 1>, scalar_prefetch = 0 : i64, scratch_operands = 1 : i64, tpu.core_type = #tpu.core_type<tc>, window_params = [{transform_indices = @transform_0, window_bounds = array<i64: 8, 32>}, {transform_indices = @transform_1, window_bounds = array<i64: 32, 128>}, {pipeline_mode = #tpu.pipeline_mode<synchronous>, transform_indices = @transform_2, window_bounds = array<i64: 1, 128>}, {transform_indices = @transform_3, window_bounds = array<i64: 8, 128>}]} {
    %c0_i32 = arith.constant 0 : i32
    %0 = arith.cmpi eq, %arg1, %c0_i32 : i32
    %1 = arith.extui %0 : i1 to i32
    %c0_i32_0 = arith.constant 0 : i32
    %2 = arith.cmpi ne, %1, %c0_i32_0 : i32
    scf.if %2 {
      %cst_10 = arith.constant 0.000000e+00 : f32
      %12 = vector.broadcast %cst_10 : f32 to vector<8x128xf32>
      %c0_11 = arith.constant 0 : index
      %c0_12 = arith.constant 0 : index
      %13 = vector.load %arg6[%c0_11, %c0_12] : memref<8x128xf32, #tpu.memory_space<vmem>>, vector<8x128xf32>
      tpu.vector_store %arg6[%c0_11, %c0_12], %12 {strides = array<i32>} : memref<8x128xf32, #tpu.memory_space<vmem>>, vector<8x128xf32>,
    } else {
    }
    %c0 = arith.constant 0 : index
    %c0_1 = arith.constant 0 : index
    %3 = vector.load %arg6[%c0, %c0_1] : memref<8x128xf32, #tpu.memory_space<vmem>>, vector<8x128xf32>
    %c0_2 = arith.constant 0 : index
    %c0_3 = arith.constant 0 : index
    %4 = vector.load %arg2[%c0_2, %c0_3] : memref<8x32xf32, #tpu.memory_space<vmem>>, vector<8x32xf32>
    %c0_4 = arith.constant 0 : index
    %c0_5 = arith.constant 0 : index
    %5 = vector.load %arg3[%c0_4, %c0_5] : memref<32x128xf32, #tpu.memory_space<vmem>>, vector<32x128xf32>
    %cst = arith.constant dense<0.000000e+00> : vector<8x128xf32>
    %6 = tpu.matmul %4, %5, %cst {dimension_numbers = #tpu.dot_dimension_numbers<[1], [0], [0], [1], [0, 0, 1, 1], [], []>} : vector<8x32xf32>, vector<32x128xf32>, vector<8x128xf32> -> vector<8x128xf32>
    %7 = arith.addf %3, %6 : vector<8x128xf32>
    %c0_6 = arith.constant 0 : index
    %c0_7 = arith.constant 0 : index
    %8 = vector.load %arg6[%c0_6, %c0_7] : memref<8x128xf32, #tpu.memory_space<vmem>>, vector<8x128xf32>
    tpu.vector_store %arg6[%c0_6, %c0_7], %7 {strides = array<i32>} : memref<8x128xf32, #tpu.memory_space<vmem>>, vector<8x128xf32>,
    %c0_i32_8 = arith.constant 0 : i32
    %9 = arith.cmpi eq, %arg1, %c0_i32_8 : i32
    %10 = arith.extui %9 : i1 to i32
    %c0_i32_9 = arith.constant 0 : i32
    %11 = arith.cmpi ne, %10, %c0_i32_9 : i32
    scf.if %11 {
      %c0_10 = arith.constant 0 : index
      %c0_11 = arith.constant 0 : index
      %12 = vector.load %arg6[%c0_10, %c0_11] : memref<8x128xf32, #tpu.memory_space<vmem>>, vector<8x128xf32>
      %c0_12 = arith.constant 0 : index
      %c0_13 = arith.constant 0 : index
      %13 = vector.load %arg4[%c0_12, %c0_13] : memref<1x128xf32, #tpu.memory_space<vmem>>, vector<1x128xf32>
      %14 = vector.broadcast %13 : vector<1x128xf32> to vector<8x128xf32>
      %15 = arith.addf %12, %14 : vector<8x128xf32>
      %16 = arith.negf %15 : vector<8x128xf32>
      %17 = math.exp %16 : vector<8x128xf32>
      %cst_14 = arith.constant 1.000000e+00 : f32
      %18 = vector.broadcast %cst_14 : f32 to vector<8x128xf32>
      %19 = arith.addf %18, %17 : vector<8x128xf32>
      %20 = arith.divf %18, %19 : vector<8x128xf32>
      %c0_15 = arith.constant 0 : index
      %c0_16 = arith.constant 0 : index
      %21 = vector.load %arg5[%c0_15, %c0_16] : memref<8x128xf32, #tpu.memory_space<vmem>>, vector<8x128xf32>
      tpu.vector_store %arg5[%c0_15, %c0_16], %20 {strides = array<i32>} : memref<8x128xf32, #tpu.memory_space<vmem>>, vector<8x128xf32>,
    } else {
    }
    return
  }
  func.func @transform_0(%arg0: i32, %arg1: i32) -> (i32, i32) {
    %c0_i32 = arith.constant 0 : i32
    return %arg0, %arg1 : i32, i32
  }
  func.func @transform_1(%arg0: i32, %arg1: i32) -> (i32, i32) {
    %c0_i32 = arith.constant 0 : i32
    %c0_i32_0 = arith.constant 0 : i32
    return %arg1, %c0_i32 : i32, i32
  }
  func.func @transform_2(%arg0: i32, %arg1: i32) -> (i32, i32) {
    %c0_i32 = arith.constant 0 : i32
    %c0_i32_0 = arith.constant 0 : i32
    %c0_i32_1 = arith.constant 0 : i32
    return %c0_i32, %c0_i32_0 : i32, i32
  }
  func.func @transform_3(%arg0: i32, %arg1: i32) -> (i32, i32) {
    %c0_i32 = arith.constant 0 : i32
    %c0_i32_0 = arith.constant 0 : i32
    return %arg0, %c0_i32 : i32, i32
  }
}

</mosaic_0001>

<bundles_post_ra>
// kernel: tpu_custom_call.1
= control target key start
LH: loop header
LB: loop body
LE: loop exit
PB: predicated region body
PF: predicated region fallthrough
CT: control target
= control target key end

     0   :  { %8 = vsyncpa [#allocation4], 0  ;;  %s256_s0 = inlined_call_operand.hbm [shape: f32[8,32], index: 0, kind: input, shape index: {}]   ;;  %s257_s1 = inlined_call_operand.hbm [shape: f32[32,128], index: 1, kind: input, shape index: {}]   ;;  %s258_s2 = inlined_call_operand.vmem [shape: f32[1,128], index: 2, kind: input, shape index: {}]   ;;  %s259_s3 = inlined_call_operand.hbm [shape: f32[8,128], index: 3, kind: output, shape index: {}]  }
   0x1   :  { %9 = vsyncpa [#allocation7], 0 }
   0x2   :  { %10 = vsyncpa [#allocation5], 0  ;;  %s16_s14 = sshll.u32 %s256_s0, 4  ;;  %s219_s15 = smov [#allocation3]   ;;  %s17_s14 = int_to_ptr.hbm [resolvable:$true] %s16_s14 }
   0x3   :  { %s18_s16 = sshll.u32 %s219_s15, 4  ;;  %s26_s19 = sshll.u32 %s257_s1, 4  ;;  %s19_s16 = int_to_ptr.vmem [resolvable:$true] %s18_s16  ;;  %s27_s19 = int_to_ptr.hbm [resolvable:$true] %s26_s19 }
   0x4   :  { %21 = dma.hbm_to_vmem [thread:$0]  %s17_s14, 128, %s19_s16, [#allocation4]  }
   0x5   :  { %s220_s20 = smov [#allocation6]   ;;  %s221_s22 = smov 128  }
   0x6   :  { %s28_s21 = sshll.u32 %s220_s20, 4  ;;  %s222_s23 = smov 8   ;;  %s29_s21 = int_to_ptr.vmem [resolvable:$true] %s28_s21 }
   0x7   :  { %34 = dma.hbm_to_vmem [thread:$0]  %s27_s19, 512, %s29_s21, [#allocation7], %s221_s22, %s221_s22, %s222_s23  }
   0x8   :  { %213 = dma.done.wait [#allocation4], 128  }
   0x9   :  { %214 = vsyncadd [#allocation4], 4294967168 }
   0xa   :  { %215 = dma.done.wait [#allocation7], 512  }
   0xb   :  { %216 = vsyncadd [#allocation7], 4294966784  ;;  %v55_v0 = vld [vmem:[#allocation6 + $0x18] sm:$0xff]  ;;  %v54_v1 = vld [vmem:[#allocation6 + $0x10] sm:$0xff]  ;;  %vm56_vm0 = vcmask 261120   ;;  %s223_s24 = smov [#allocation8]  }
   0xc   :  { %72 = vmatpush.msra.mxu0 %v55_v0  ;;  %v53_v2 = vld [vmem:[#allocation6 + $0x8] sm:$0xff]  ;;  %v52_v3 = vld [vmem:[#allocation6] sm:$0xff]  ;;  %v51_v4 = vld [vmem:[#allocation3] sm:$0xff]  ;;  %s116_s25 = sshll.u32 %s223_s24, 4  ;;  %s117_s25 = int_to_ptr.vmem [resolvable:$true] %s116_s25 }
   0xd   :  { %v136_v5 = vld [vmem:[%s258_s2] ss:$0 sm:$0xff]  ;;  %s118_s2 = sshll.u32 %s259_s3, 4  ;;  %s119_s2 = int_to_ptr.hbm [resolvable:$true] %s118_s2 }
   0xe   :  { %73 = vmatpush.msra.mxu0 %v54_v1 }
  0x10   :  { %74 = vmatpush.msra.mxu0 %v53_v2 }
  0x12   :  { %75 = vmatpush.msra.mxu0 %v52_v3 }
  0x13   :  { %129 = vmatmul.msk.f32.vlgmr.msra.gmra.mxu0 %vm56_vm0, %v51_v4 }
  0x90   :  { %v77_v6 = vpop.f32.mrf.mxu0 }
  0x91   :  { %v90_v7 = vadd.f32 %v136_v5, %v77_v6 }
  0x93   :  { %v130_v8 = vmul.f32 -1.442695, %v90_v7 }
  0x95   :  { %137 = vpow2.f32 %v130_v8 }
  0x9b   :  { %v138_v9 = vpop.eup %137 }
  0x9c   :  { %v94_v10 = vadd.f32 1.0, %v138_v9 }
  0x9e   :  { %139 = vrcp.f32 %v94_v10  ;;  %v106_v14 = vand.u32 2147483648, %v94_v10  ;;  %v104_v16 = vand.u32 2147483647, %v94_v10  ;;  %vm100_vm2 = vweird.f32 %v94_v10 }
  0xa0   :  { %v107_v18 = vor.u32 1.1754944e-38, %v106_v14  ;;  %vm105_vm4 = vcmp.eq.f32.partialorder %v104_v16, 8.507059e+37 }
  0xa4   :  { %v140_v11 = vpop.eup %139 }
  0xa5   :  { %v96_v12 = vmul.f32 %v140_v11, %v94_v10  ;;  %vm101_vm1 = vweird.f32 %v140_v11 }
  0xa6   :  { %vm102_vm3 = vmor %vm100_vm2, %vm101_vm1 }
  0xa7   :  { %v97_v13 = vsub.f32 1.0, %v96_v12 }
  0xa9   :  { %v98_v15 = vmul.f32 %v140_v11, %v97_v13 }
  0xab   :  { %v99_v17 = vadd.f32 %v140_v11, %v98_v15 }
  0xad   :  { %v103_v19 = vsel %vm102_vm3, %v140_v11, %v99_v17 }
  0xae   :  { %v108_v20 = vsel %vm105_vm4, %v107_v18, %v103_v19 }
  0xaf   :  { %110 = vst [vmem:[#allocation8] sm:$0xff] %v108_v20 }
  0xb0   :  { %121 = dma.vmem_to_hbm [thread:$0]  %s117_s25, 128, %s119_s2, [#allocation5]  }
  0xb1   :  { %217 = dma.done.wait [#allocation5], 128  }
  0xb2   :  { %218 = vsyncadd [#allocation5], 4294967168 }
  0xb3   :  { %126 = vsyncpa [#allocation4], 1 }
  0xb4   :  { %127 = vsyncpa [#allocation7], 1 }
  0xb5   :  { %128 = vsyncpa [#allocation5], 1 }

</bundles_post_ra>
